<compile_context>
chip_gen: v5e
topology: v5e:2x2
jax: 0.10.0
libtpu: 0.0.40
codegen_flags: <defaults>
</compile_context>

<pallas_src>
from math import sqrt
import functools

import jax
import jax.numpy as jnp
from jax import lax
from jax.experimental import pallas as pl
from jax.experimental.pallas import tpu as pltpu


def _residual_mha_kernel(x_q_ref, x_kv_ref, wq_ref, wk_ref, wv_ref,
                         bq_ref, bk_ref, bv_ref, wf_ref, bf_ref,
                         o_ref,
                         q_scr, m_scr, l_scr, acc_scr,
                         *, num_heads):
    # x_q_ref:  (1, tq, E)   query / residual tile of x
    # x_kv_ref: (1, tk, E)   key/value tile of x
    # wq/wk/wv/wf_ref: (E, E) bf16     bq/bk/bv/bf_ref: (1, E) f32
    # o_ref: (1, tq, E)
    # q_scr: (tq, E) bf16    m_scr/l_scr: (tq, H) f32    acc_scr: (tq, E) f32
    ki = pl.program_id(2)
    nk = pl.num_programs(2)
    tq, E = q_scr.shape
    H = num_heads
    Dh = E // H

    # ---- init per (batch, q-tile): q projection once + reset online-softmax state ----
    @pl.when(ki == 0)
    def _():
        xq = x_q_ref[0].astype(jnp.bfloat16)                               # (tq, E)
        q = jnp.dot(xq, wq_ref[...],
                    preferred_element_type=jnp.float32) + bq_ref[...]      # f32 acc
        q_scr[...] = q.astype(jnp.bfloat16)
        m_scr[...] = jnp.full_like(m_scr, -jnp.inf)
        l_scr[...] = jnp.zeros_like(l_scr)
        acc_scr[...] = jnp.zeros_like(acc_scr)

    # ---- k/v projection for this kv tile: flat lane-dense MXU matmuls ---------------
    xkv = x_kv_ref[0].astype(jnp.bfloat16)                                 # (tk, E)
    k = (jnp.dot(xkv, wk_ref[...], preferred_element_type=jnp.float32)
         + bk_ref[...]).astype(jnp.bfloat16)                               # (tk, E)
    v = (jnp.dot(xkv, wv_ref[...], preferred_element_type=jnp.float32)
         + bv_ref[...]).astype(jnp.bfloat16)                               # (tk, E)

    q = q_scr[...]                                                         # (tq, E) bf16

    # ---- per-head online softmax (heads live on static lane slabs; math in f32) -----
    for h in range(H):
        hs = slice(h * Dh, (h + 1) * Dh)
        # q_h (tq, Dh) . k_h (tk, Dh)^T via contracting dims (no explicit transpose).
        e = lax.dot_general(q[:, hs], k[:, hs],
                            (((1,), (1,)), ((), ())),
                            preferred_element_type=jnp.float32)            # (tq, tk)
        m_prev = m_scr[:, h:h + 1]                                         # (tq, 1)
        m_new = jnp.maximum(m_prev, jnp.max(e, axis=-1, keepdims=True))
        alpha = jnp.exp(m_prev - m_new)
        p = jnp.exp(e - m_new)                                             # (tq, tk) f32
        l_scr[:, h:h + 1] = alpha * l_scr[:, h:h + 1] + jnp.sum(p, axis=-1,
                                                                keepdims=True)
        acc_scr[:, hs] = alpha * acc_scr[:, hs] + jnp.dot(
            p.astype(jnp.bfloat16), v[:, hs],
            preferred_element_type=jnp.float32)                            # (tq, Dh)
        m_scr[:, h:h + 1] = m_new

    # ---- finalize: normalize (module quirk: softmax of UNscaled energy, then /sqrt(E)),
    #      one K=E final-projection matmul over lane-fused heads, residual add ---------
    @pl.when(ki == nk - 1)
    def _():
        scale = sqrt(float(E))
        for h in range(H):
            hs = slice(h * Dh, (h + 1) * Dh)
            inv = pl.reciprocal(l_scr[:, h:h + 1] * scale)     # 1/sqrt(E) folded in
            acc_scr[:, hs] = acc_scr[:, hs] * inv
        ctx = acc_scr[...].astype(jnp.bfloat16)                # (tq, E) = concat_h ctx_h
        attn = jnp.dot(ctx, wf_ref[...],
                       preferred_element_type=jnp.float32) + bf_ref[...]   # (tq, E)
        # dropout == identity (eval mode)
        o_ref[0] = (x_q_ref[0] + attn).astype(o_ref.dtype)     # ResidualAdd


def residual_add_mha(x, w_proj, b_proj, w_final, b_final, *, num_heads,
                     q_tile=None, kv_tile=None, vmem_limit_bytes=None):
    """ResidualAdd(MultiHeadAttention): out = x + MHA(x).

    x:       (B, N, E)
    w_proj:  (E, 3E)  qkv Linear weight stored (in, out); columns = [q | k | v]
    b_proj:  (3E,)
    w_final: (E, E)   output Linear weight stored (in, out)
    b_final: (E,)
    """
    B, N, E = x.shape
    H = num_heads
    assert E % H == 0, "embed_size must be divisible by num_heads"

    def pick_tile(t):
        if t is not None:
            assert N % t == 0, "sequence length must be divisible by the tile size"
            return t
        for cand in (256, 128):           # 256-aligned for v6e/v7x, 128 for v5e
            if N % cand == 0:
                return cand
        return N                          # small/toy sequences: single tile
    tq = pick_tile(q_tile)
    tk = pick_tile(kv_tile)
    nq, nk = N // tq, N // tk

    # Weights once, in bf16 for the MXU; biases stay f32 (added to f32 accumulators).
    bf16, f32 = jnp.bfloat16, jnp.float32
    wq = w_proj[:, 0 * E:1 * E].astype(bf16)
    wk = w_proj[:, 1 * E:2 * E].astype(bf16)
    wv = w_proj[:, 2 * E:3 * E].astype(bf16)
    bq = b_proj[0 * E:1 * E].reshape(1, E).astype(f32)
    bk = b_proj[1 * E:2 * E].reshape(1, E).astype(f32)
    bv = b_proj[2 * E:3 * E].reshape(1, E).astype(f32)
    wf = w_final.astype(bf16)
    bf = b_final.reshape(1, E).astype(f32)

    full = lambda r, c: pl.BlockSpec((r, c), lambda b, qi, ki: (0, 0))
    kernel = functools.partial(_residual_mha_kernel, num_heads=H)

    return pl.pallas_call(
        kernel,
        out_shape=jax.ShapeDtypeStruct((B, N, E), x.dtype),
        grid=(B, nq, nk),
        in_specs=[
            pl.BlockSpec((1, tq, E), lambda b, qi, ki: (b, qi, 0)),   # x: q / residual tile
            pl.BlockSpec((1, tk, E), lambda b, qi, ki: (b, ki, 0)),   # x: kv tile
            full(E, E), full(E, E), full(E, E),                       # wq wk wv
            full(1, E), full(1, E), full(1, E),                       # bq bk bv
            full(E, E), full(1, E),                                   # wf bf
        ],
        out_specs=pl.BlockSpec((1, tq, E), lambda b, qi, ki: (b, qi, 0)),
        scratch_shapes=[
            pltpu.VMEM((tq, E), jnp.bfloat16),   # cached q projection
            pltpu.VMEM((tq, H), jnp.float32),    # online-softmax m
            pltpu.VMEM((tq, H), jnp.float32),    # online-softmax l
            pltpu.VMEM((tq, E), jnp.float32),    # lane-fused context accumulator
        ],
        compiler_params=pltpu.CompilerParams(
            dimension_semantics=("parallel", "parallel", "arbitrary"),
            vmem_limit_bytes=vmem_limit_bytes),
    )(x, x, wq, wk, wv, bq, bk, bv, wf, bf)


def _reference(x, w_proj, b_proj, w_final, b_final, *, num_heads):
    """Pure-JAX (f32) restatement of ResidualAdd(MultiHeadAttention), eval mode."""
    B, N, E = x.shape
    H = num_heads
    Dh = E // H
    qkv = x @ w_proj + b_proj                       # (B, N, 3E)
    q, k, v = qkv[..., :E], qkv[..., E:2 * E], qkv[..., 2 * E:]
    q = q.reshape(B, N, H, Dh)
    k = k.reshape(B, N, H, Dh)
    v = v.reshape(B, N, H, Dh)
    energy = jnp.einsum('bqhe,bkhe->bqhk', q, k)
    probs = jax.nn.softmax(energy, axis=-1)
    out = jnp.einsum('bihv,bvhd->bihd', probs / sqrt(float(E)), v)
    out = out.reshape(B, N, E)
    attn = out @ w_final + b_final
    return x + attn                                 # ResidualAdd


if __name__ == "__main__":
    B, N, E, H = 2, 8, 32, 4

    key = jax.random.PRNGKey(0)
    kx, kwp, kbp, kwf, kbf = jax.random.split(key, 5)

    x = jax.random.normal(kx, (B, N, E), dtype=jnp.float32)
    w_proj = jax.random.normal(kwp, (E, 3 * E), dtype=jnp.float32) * 0.05
    b_proj = jax.random.normal(kbp, (3 * E,), dtype=jnp.float32) * 0.05
    w_final = jax.random.normal(kwf, (E, E), dtype=jnp.float32) * 0.05
    b_final = jax.random.normal(kbf, (E,), dtype=jnp.float32) * 0.05

    out = residual_add_mha(x, w_proj, b_proj, w_final, b_final, num_heads=H)
    out = jax.block_until_ready(out)

    ref = _reference(x, w_proj, b_proj, w_final, b_final, num_heads=H)
    assert out.shape == (B, N, E)
    # bf16 MXU operands (f32 accumulation / f32 softmax) => slightly looser tolerance.
    assert jnp.allclose(out, ref, atol=2e-2, rtol=2e-2), "mismatch vs reference"

    print("KERNEL_OK")
</pallas_src>

<mosaic_0001>
module attributes {stable_mosaic.version = 11 : i64} {
  func.func @_residual_mha_kernel(%arg0: i32, %arg1: i32, %arg2: i32, %arg3: memref<1x8x32xf32, #tpu.memory_space<vmem>>, %arg4: memref<1x8x32xf32, #tpu.memory_space<vmem>>, %arg5: memref<32x32xbf16, #tpu.memory_space<vmem>>, %arg6: memref<32x32xbf16, #tpu.memory_space<vmem>>, %arg7: memref<32x32xbf16, #tpu.memory_space<vmem>>, %arg8: memref<1x32xf32, #tpu.memory_space<vmem>>, %arg9: memref<1x32xf32, #tpu.memory_space<vmem>>, %arg10: memref<1x32xf32, #tpu.memory_space<vmem>>, %arg11: memref<32x32xbf16, #tpu.memory_space<vmem>>, %arg12: memref<1x32xf32, #tpu.memory_space<vmem>>, %arg13: memref<1x8x32xf32, #tpu.memory_space<vmem>>, %arg14: memref<8x32xbf16, #tpu.memory_space<vmem>>, %arg15: memref<8x4xf32, #tpu.memory_space<vmem>>, %arg16: memref<8x4xf32, #tpu.memory_space<vmem>>, %arg17: memref<8x32xf32, #tpu.memory_space<vmem>>) attributes {dimension_semantics = [#tpu.dimension_semantics<parallel>, #tpu.dimension_semantics<parallel>, #tpu.dimension_semantics<arbitrary>], iteration_bounds = array<i64: 2, 1, 1>, scalar_prefetch = 0 : i64, scratch_operands = 4 : i64, tpu.core_type = #tpu.core_type<tc>, window_params = [{transform_indices = @transform_0, window_bounds = array<i64: 1, 8, 32>}, {transform_indices = @transform_1, window_bounds = array<i64: 1, 8, 32>}, {pipeline_mode = #tpu.pipeline_mode<synchronous>, transform_indices = @transform_2, window_bounds = array<i64: 32, 32>}, {pipeline_mode = #tpu.pipeline_mode<synchronous>, transform_indices = @transform_3, window_bounds = array<i64: 32, 32>}, {pipeline_mode = #tpu.pipeline_mode<synchronous>, transform_indices = @transform_4, window_bounds = array<i64: 32, 32>}, {pipeline_mode = #tpu.pipeline_mode<synchronous>, transform_indices = @transform_5, window_bounds = array<i64: 1, 32>}, {pipeline_mode = #tpu.pipeline_mode<synchronous>, transform_indices = @transform_6, window_bounds = array<i64: 1, 32>}, {pipeline_mode = #tpu.pipeline_mode<synchronous>, transform_indices = @transform_7, window_bounds = array<i64: 1, 32>}, {pipeline_mode = #tpu.pipeline_mode<synchronous>, transform_indices = @transform_8, window_bounds = array<i64: 32, 32>}, {pipeline_mode = #tpu.pipeline_mode<synchronous>, transform_indices = @transform_9, window_bounds = array<i64: 1, 32>}, {transform_indices = @transform_10, window_bounds = array<i64: 1, 8, 32>}]} {
    %c0_i32 = arith.constant 0 : i32
    %0 = arith.cmpi eq, %arg2, %c0_i32 : i32
    %1 = arith.extui %0 : i1 to i32
    %c0_i32_0 = arith.constant 0 : i32
    %2 = arith.cmpi ne, %1, %c0_i32_0 : i32
    scf.if %2 {
      %c0_74 = arith.constant 0 : index
      %c0_75 = arith.constant 0 : index
      %c0_76 = arith.constant 0 : index
      %130 = vector.load %arg3[%c0_74, %c0_75, %c0_76] : memref<1x8x32xf32, #tpu.memory_space<vmem>>, vector<1x8x32xf32>
      %131 = vector.shape_cast %130 : vector<1x8x32xf32> to vector<8x32xf32>
      %132 = arith.truncf %131 : vector<8x32xf32> to vector<8x32xbf16>
      %c0_77 = arith.constant 0 : index
      %c0_78 = arith.constant 0 : index
      %133 = vector.load %arg5[%c0_77, %c0_78] : memref<32x32xbf16, #tpu.memory_space<vmem>>, vector<32x32xbf16>
      %cst_79 = arith.constant dense<0.000000e+00> : vector<8x32xf32>
      %134 = tpu.matmul %132, %133, %cst_79 {dimension_numbers = #tpu.dot_dimension_numbers<[1], [0], [0], [1], [0, 0, 1, 1], [], []>} : vector<8x32xbf16>, vector<32x32xbf16>, vector<8x32xf32> -> vector<8x32xf32>
      %c0_80 = arith.constant 0 : index
      %c0_81 = arith.constant 0 : index
      %135 = vector.load %arg8[%c0_80, %c0_81] : memref<1x32xf32, #tpu.memory_space<vmem>>, vector<1x32xf32>
      %136 = vector.broadcast %135 : vector<1x32xf32> to vector<8x32xf32>
      %137 = arith.addf %134, %136 : vector<8x32xf32>
      %138 = arith.truncf %137 : vector<8x32xf32> to vector<8x32xbf16>
      %c0_82 = arith.constant 0 : index
      %c0_83 = arith.constant 0 : index
      %139 = vector.load %arg14[%c0_82, %c0_83] : memref<8x32xbf16, #tpu.memory_space<vmem>>, vector<8x32xbf16>
      tpu.vector_store %arg14[%c0_82, %c0_83], %138 {strides = array<i32>} : memref<8x32xbf16, #tpu.memory_space<vmem>>, vector<8x32xbf16>,
      %cst_84 = arith.constant 0xFF800000 : f32
      %140 = vector.broadcast %cst_84 : f32 to vector<8x4xf32>
      %c0_85 = arith.constant 0 : index
      %c0_86 = arith.constant 0 : index
      %141 = vector.load %arg15[%c0_85, %c0_86] : memref<8x4xf32, #tpu.memory_space<vmem>>, vector<8x4xf32>
      tpu.vector_store %arg15[%c0_85, %c0_86], %140 {strides = array<i32>} : memref<8x4xf32, #tpu.memory_space<vmem>>, vector<8x4xf32>,
      %cst_87 = arith.constant 0.000000e+00 : f32
      %142 = vector.broadcast %cst_87 : f32 to vector<8x4xf32>
      %c0_88 = arith.constant 0 : index
      %c0_89 = arith.constant 0 : index
      %143 = vector.load %arg16[%c0_88, %c0_89] : memref<8x4xf32, #tpu.memory_space<vmem>>, vector<8x4xf32>
      tpu.vector_store %arg16[%c0_88, %c0_89], %142 {strides = array<i32>} : memref<8x4xf32, #tpu.memory_space<vmem>>, vector<8x4xf32>,
      %cst_90 = arith.constant 0.000000e+00 : f32
      %144 = vector.broadcast %cst_90 : f32 to vector<8x32xf32>
      %c0_91 = arith.constant 0 : index
      %c0_92 = arith.constant 0 : index
      %145 = vector.load %arg17[%c0_91, %c0_92] : memref<8x32xf32, #tpu.memory_space<vmem>>, vector<8x32xf32>
      tpu.vector_store %arg17[%c0_91, %c0_92], %144 {strides = array<i32>} : memref<8x32xf32, #tpu.memory_space<vmem>>, vector<8x32xf32>,
    } else {
    }
    %c0 = arith.constant 0 : index
    %c0_1 = arith.constant 0 : index
    %c0_2 = arith.constant 0 : index
    %3 = vector.load %arg4[%c0, %c0_1, %c0_2] : memref<1x8x32xf32, #tpu.memory_space<vmem>>, vector<1x8x32xf32>
    %4 = vector.shape_cast %3 : vector<1x8x32xf32> to vector<8x32xf32>
    %5 = arith.truncf %4 : vector<8x32xf32> to vector<8x32xbf16>
    %c0_3 = arith.constant 0 : index
    %c0_4 = arith.constant 0 : index
    %6 = vector.load %arg6[%c0_3, %c0_4] : memref<32x32xbf16, #tpu.memory_space<vmem>>, vector<32x32xbf16>
    %cst = arith.constant dense<0.000000e+00> : vector<8x32xf32>
    %7 = tpu.matmul %5, %6, %cst {dimension_numbers = #tpu.dot_dimension_numbers<[1], [0], [0], [1], [0, 0, 1, 1], [], []>} : vector<8x32xbf16>, vector<32x32xbf16>, vector<8x32xf32> -> vector<8x32xf32>
    %c0_5 = arith.constant 0 : index
    %c0_6 = arith.constant 0 : index
    %8 = vector.load %arg9[%c0_5, %c0_6] : memref<1x32xf32, #tpu.memory_space<vmem>>, vector<1x32xf32>
    %9 = vector.broadcast %8 : vector<1x32xf32> to vector<8x32xf32>
    %10 = arith.addf %7, %9 : vector<8x32xf32>
    %11 = arith.truncf %10 : vector<8x32xf32> to vector<8x32xbf16>
    %c0_7 = arith.constant 0 : index
    %c0_8 = arith.constant 0 : index
    %12 = vector.load %arg7[%c0_7, %c0_8] : memref<32x32xbf16, #tpu.memory_space<vmem>>, vector<32x32xbf16>
    %cst_9 = arith.constant dense<0.000000e+00> : vector<8x32xf32>
    %13 = tpu.matmul %5, %12, %cst_9 {dimension_numbers = #tpu.dot_dimension_numbers<[1], [0], [0], [1], [0, 0, 1, 1], [], []>} : vector<8x32xbf16>, vector<32x32xbf16>, vector<8x32xf32> -> vector<8x32xf32>
    %c0_10 = arith.constant 0 : index
    %c0_11 = arith.constant 0 : index
    %14 = vector.load %arg10[%c0_10, %c0_11] : memref<1x32xf32, #tpu.memory_space<vmem>>, vector<1x32xf32>
    %15 = vector.broadcast %14 : vector<1x32xf32> to vector<8x32xf32>
    %16 = arith.addf %13, %15 : vector<8x32xf32>
    %17 = arith.truncf %16 : vector<8x32xf32> to vector<8x32xbf16>
    %c0_12 = arith.constant 0 : index
    %c0_13 = arith.constant 0 : index
    %18 = vector.load %arg14[%c0_12, %c0_13] : memref<8x32xbf16, #tpu.memory_space<vmem>>, vector<8x32xbf16>
    %19 = vector.extract_strided_slice %18 {offsets = [0, 0], sizes = [8, 8], strides = [1, 1]} : vector<8x32xbf16> to vector<8x8xbf16>
    %20 = vector.extract_strided_slice %11 {offsets = [0, 0], sizes = [8, 8], strides = [1, 1]} : vector<8x32xbf16> to vector<8x8xbf16>
    %cst_14 = arith.constant dense<0.000000e+00> : vector<8x8xf32>
    %21 = tpu.matmul %19, %20, %cst_14 {dimension_numbers = #tpu.dot_dimension_numbers<[1], [1], [0], [0], [0, 0, 1, 0], [], []>} : vector<8x8xbf16>, vector<8x8xbf16>, vector<8x8xf32> -> vector<8x8xf32>
    %c0_15 = arith.constant 0 : index
    %c0_16 = arith.constant 0 : index
    %22 = vector.load %arg15[%c0_15, %c0_16] : memref<8x4xf32, #tpu.memory_space<vmem>>, vector<8x1xf32>
    %cst_17 = arith.constant dense<0xFF800000> : vector<8xf32>
    %23 = vector.multi_reduction <maximumf>, %21, %cst_17 [1] : vector<8x8xf32> to vector<8xf32>
    %24 = vector.shape_cast %23 : vector<8xf32> to vector<8x1xf32>
    %25 = arith.maximumf %22, %24 : vector<8x1xf32>
    %26 = arith.subf %22, %25 : vector<8x1xf32>
    %27 = math.exp %26 : vector<8x1xf32>
    %28 = vector.broadcast %25 : vector<8x1xf32> to vector<8x8xf32>
    %29 = arith.subf %21, %28 : vector<8x8xf32>
    %30 = math.exp %29 : vector<8x8xf32>
    %c0_18 = arith.constant 0 : index
    %c0_19 = arith.constant 0 : index
    %31 = vector.load %arg16[%c0_18, %c0_19] : memref<8x4xf32, #tpu.memory_space<vmem>>, vector<8x1xf32>
    %32 = arith.mulf %27, %31 : vector<8x1xf32>
    %cst_20 = arith.constant dense<0.000000e+00> : vector<8xf32>
    %33 = vector.multi_reduction <add>, %30, %cst_20 [1] : vector<8x8xf32> to vector<8xf32>
    %34 = vector.shape_cast %33 : vector<8xf32> to vector<8x1xf32>
    %35 = arith.addf %32, %34 : vector<8x1xf32>
    %c0_21 = arith.constant 0 : index
    %c0_22 = arith.constant 0 : index
    %36 = vector.load %arg16[%c0_21, %c0_22] : memref<8x4xf32, #tpu.memory_space<vmem>>, vector<8x1xf32>
    tpu.vector_store %arg16[%c0_21, %c0_22], %35 {strides = array<i32>} : memref<8x4xf32, #tpu.memory_space<vmem>>, vector<8x1xf32>,
    %c0_23 = arith.constant 0 : index
    %c0_24 = arith.constant 0 : index
    %37 = vector.load %arg17[%c0_23, %c0_24] : memref<8x32xf32, #tpu.memory_space<vmem>>, vector<8x8xf32>
    %38 = vector.broadcast %27 : vector<8x1xf32> to vector<8x8xf32>
    %39 = arith.mulf %38, %37 : vector<8x8xf32>
    %40 = arith.truncf %30 : vector<8x8xf32> to vector<8x8xbf16>
    %41 = vector.extract_strided_slice %17 {offsets = [0, 0], sizes = [8, 8], strides = [1, 1]} : vector<8x32xbf16> to vector<8x8xbf16>
    %cst_25 = arith.constant dense<0.000000e+00> : vector<8x8xf32>
    %42 = tpu.matmul %40, %41, %cst_25 {dimension_numbers = #tpu.dot_dimension_numbers<[1], [0], [0], [1], [0, 0, 1, 1], [], []>} : vector<8x8xbf16>, vector<8x8xbf16>, vector<8x8xf32> -> vector<8x8xf32>
    %43 = arith.addf %39, %42 : vector<8x8xf32>
    %c0_26 = arith.constant 0 : index
    %c0_27 = arith.constant 0 : index
    %44 = vector.load %arg17[%c0_26, %c0_27] : memref<8x32xf32, #tpu.memory_space<vmem>>, vector<8x8xf32>
    tpu.vector_store %arg17[%c0_26, %c0_27], %43 {strides = array<i32>} : memref<8x32xf32, #tpu.memory_space<vmem>>, vector<8x8xf32>,
    %c0_28 = arith.constant 0 : index
    %c0_29 = arith.constant 0 : index
    %45 = vector.load %arg15[%c0_28, %c0_29] : memref<8x4xf32, #tpu.memory_space<vmem>>, vector<8x1xf32>
    tpu.vector_store %arg15[%c0_28, %c0_29], %25 {strides = array<i32>} : memref<8x4xf32, #tpu.memory_space<vmem>>, vector<8x1xf32>,
    %46 = vector.extract_strided_slice %18 {offsets = [0, 8], sizes = [8, 8], strides = [1, 1]} : vector<8x32xbf16> to vector<8x8xbf16>
    %47 = vector.extract_strided_slice %11 {offsets = [0, 8], sizes = [8, 8], strides = [1, 1]} : vector<8x32xbf16> to vector<8x8xbf16>
    %cst_30 = arith.constant dense<0.000000e+00> : vector<8x8xf32>
    %48 = tpu.matmul %46, %47, %cst_30 {dimension_numbers = #tpu.dot_dimension_numbers<[1], [1], [0], [0], [0, 0, 1, 0], [], []>} : vector<8x8xbf16>, vector<8x8xbf16>, vector<8x8xf32> -> vector<8x8xf32>
    %c0_31 = arith.constant 0 : index
    %c1 = arith.constant 1 : index
    %49 = vector.load %arg15[%c0_31, %c1] : memref<8x4xf32, #tpu.memory_space<vmem>>, vector<8x1xf32>
    %cst_32 = arith.constant dense<0xFF800000> : vector<8xf32>
    %50 = vector.multi_reduction <maximumf>, %48, %cst_32 [1] : vector<8x8xf32> to vector<8xf32>
    %51 = vector.shape_cast %50 : vector<8xf32> to vector<8x1xf32>
    %52 = arith.maximumf %49, %51 : vector<8x1xf32>
    %53 = arith.subf %49, %52 : vector<8x1xf32>
    %54 = math.exp %53 : vector<8x1xf32>
    %55 = vector.broadcast %52 : vector<8x1xf32> to vector<8x8xf32>
    %56 = arith.subf %48, %55 : vector<8x8xf32>
    %57 = math.exp %56 : vector<8x8xf32>
    %c0_33 = arith.constant 0 : index
    %c1_34 = arith.constant 1 : index
    %58 = vector.load %arg16[%c0_33, %c1_34] : memref<8x4xf32, #tpu.memory_space<vmem>>, vector<8x1xf32>
    %59 = arith.mulf %54, %58 : vector<8x1xf32>
    %cst_35 = arith.constant dense<0.000000e+00> : vector<8xf32>
    %60 = vector.multi_reduction <add>, %57, %cst_35 [1] : vector<8x8xf32> to vector<8xf32>
    %61 = vector.shape_cast %60 : vector<8xf32> to vector<8x1xf32>
    %62 = arith.addf %59, %61 : vector<8x1xf32>
    %c0_36 = arith.constant 0 : index
    %c1_37 = arith.constant 1 : index
    %63 = vector.load %arg16[%c0_36, %c1_37] : memref<8x4xf32, #tpu.memory_space<vmem>>, vector<8x1xf32>
    tpu.vector_store %arg16[%c0_36, %c1_37], %62 {strides = array<i32>} : memref<8x4xf32, #tpu.memory_space<vmem>>, vector<8x1xf32>,
    %c0_38 = arith.constant 0 : index
    %c8 = arith.constant 8 : index
    %64 = vector.load %arg17[%c0_38, %c8] : memref<8x32xf32, #tpu.memory_space<vmem>>, vector<8x8xf32>
    %65 = vector.broadcast %54 : vector<8x1xf32> to vector<8x8xf32>
    %66 = arith.mulf %65, %64 : vector<8x8xf32>
    %67 = arith.truncf %57 : vector<8x8xf32> to vector<8x8xbf16>
    %68 = vector.extract_strided_slice %17 {offsets = [0, 8], sizes = [8, 8], strides = [1, 1]} : vector<8x32xbf16> to vector<8x8xbf16>
    %cst_39 = arith.constant dense<0.000000e+00> : vector<8x8xf32>
    %69 = tpu.matmul %67, %68, %cst_39 {dimension_numbers = #tpu.dot_dimension_numbers<[1], [0], [0], [1], [0, 0, 1, 1], [], []>} : vector<8x8xbf16>, vector<8x8xbf16>, vector<8x8xf32> -> vector<8x8xf32>
    %70 = arith.addf %66, %69 : vector<8x8xf32>
    %c0_40 = arith.constant 0 : index
    %c8_41 = arith.constant 8 : index
    %71 = vector.load %arg17[%c0_40, %c8_41] : memref<8x32xf32, #tpu.memory_space<vmem>>, vector<8x8xf32>
    tpu.vector_store %arg17[%c0_40, %c8_41], %70 {strides = array<i32>} : memref<8x32xf32, #tpu.memory_space<vmem>>, vector<8x8xf32>,
    %c0_42 = arith.constant 0 : index
    %c1_43 = arith.constant 1 : index
    %72 = vector.load %arg15[%c0_42, %c1_43] : memref<8x4xf32, #tpu.memory_space<vmem>>, vector<8x1xf32>
    tpu.vector_store %arg15[%c0_42, %c1_43], %52 {strides = array<i32>} : memref<8x4xf32, #tpu.memory_space<vmem>>, vector<8x1xf32>,
    %73 = vector.extract_strided_slice %18 {offsets = [0, 16], sizes = [8, 8], strides = [1, 1]} : vector<8x32xbf16> to vector<8x8xbf16>
    %74 = vector.extract_strided_slice %11 {offsets = [0, 16], sizes = [8, 8], strides = [1, 1]} : vector<8x32xbf16> to vector<8x8xbf16>
    %cst_44 = arith.constant dense<0.000000e+00> : vector<8x8xf32>
    %75 = tpu.matmul %73, %74, %cst_44 {dimension_numbers = #tpu.dot_dimension_numbers<[1], [1], [0], [0], [0, 0, 1, 0], [], []>} : vector<8x8xbf16>, vector<8x8xbf16>, vector<8x8xf32> -> vector<8x8xf32>
    %c0_45 = arith.constant 0 : index
    %c2 = arith.constant 2 : index
    %76 = vector.load %arg15[%c0_45, %c2] : memref<8x4xf32, #tpu.memory_space<vmem>>, vector<8x1xf32>
    %cst_46 = arith.constant dense<0xFF800000> : vector<8xf32>
    %77 = vector.multi_reduction <maximumf>, %75, %cst_46 [1] : vector<8x8xf32> to vector<8xf32>
    %78 = vector.shape_cast %77 : vector<8xf32> to vector<8x1xf32>
    %79 = arith.maximumf %76, %78 : vector<8x1xf32>
    %80 = arith.subf %76, %79 : vector<8x1xf32>
    %81 = math.exp %80 : vector<8x1xf32>
    %82 = vector.broadcast %79 : vector<8x1xf32> to vector<8x8xf32>
    %83 = arith.subf %75, %82 : vector<8x8xf32>
    %84 = math.exp %83 : vector<8x8xf32>
    %c0_47 = arith.constant 0 : index
    %c2_48 = arith.constant 2 : index
    %85 = vector.load %arg16[%c0_47, %c2_48] : memref<8x4xf32, #tpu.memory_space<vmem>>, vector<8x1xf32>
    %86 = arith.mulf %81, %85 : vector<8x1xf32>
    %cst_49 = arith.constant dense<0.000000e+00> : vector<8xf32>
    %87 = vector.multi_reduction <add>, %84, %cst_49 [1] : vector<8x8xf32> to vector<8xf32>
    %88 = vector.shape_cast %87 : vector<8xf32> to vector<8x1xf32>
    %89 = arith.addf %86, %88 : vector<8x1xf32>
    %c0_50 = arith.constant 0 : index
    %c2_51 = arith.constant 2 : index
    %90 = vector.load %arg16[%c0_50, %c2_51] : memref<8x4xf32, #tpu.memory_space<vmem>>, vector<8x1xf32>
    tpu.vector_store %arg16[%c0_50, %c2_51], %89 {strides = array<i32>} : memref<8x4xf32, #tpu.memory_space<vmem>>, vector<8x1xf32>,
    %c0_52 = arith.constant 0 : index
    %c16 = arith.constant 16 : index
    %91 = vector.load %arg17[%c0_52, %c16] : memref<8x32xf32, #tpu.memory_space<vmem>>, vector<8x8xf32>
    %92 = vector.broadcast %81 : vector<8x1xf32> to vector<8x8xf32>
    %93 = arith.mulf %92, %91 : vector<8x8xf32>
    %94 = arith.truncf %84 : vector<8x8xf32> to vector<8x8xbf16>
    %95 = vector.extract_strided_slice %17 {offsets = [0, 16], sizes = [8, 8], strides = [1, 1]} : vector<8x32xbf16> to vector<8x8xbf16>
    %cst_53 = arith.constant dense<0.000000e+00> : vector<8x8xf32>
    %96 = tpu.matmul %94, %95, %cst_53 {dimension_numbers = #tpu.dot_dimension_numbers<[1], [0], [0], [1], [0, 0, 1, 1], [], []>} : vector<8x8xbf16>, vector<8x8xbf16>, vector<8x8xf32> -> vector<8x8xf32>
    %97 = arith.addf %93, %96 : vector<8x8xf32>
    %c0_54 = arith.constant 0 : index
    %c16_55 = arith.constant 16 : index
    %98 = vector.load %arg17[%c0_54, %c16_55] : memref<8x32xf32, #tpu.memory_space<vmem>>, vector<8x8xf32>
    tpu.vector_store %arg17[%c0_54, %c16_55], %97 {strides = array<i32>} : memref<8x32xf32, #tpu.memory_space<vmem>>, vector<8x8xf32>,
    %c0_56 = arith.constant 0 : index
    %c2_57 = arith.constant 2 : index
    %99 = vector.load %arg15[%c0_56, %c2_57] : memref<8x4xf32, #tpu.memory_space<vmem>>, vector<8x1xf32>
    tpu.vector_store %arg15[%c0_56, %c2_57], %79 {strides = array<i32>} : memref<8x4xf32, #tpu.memory_space<vmem>>, vector<8x1xf32>,
    %100 = vector.extract_strided_slice %18 {offsets = [0, 24], sizes = [8, 8], strides = [1, 1]} : vector<8x32xbf16> to vector<8x8xbf16>
    %101 = vector.extract_strided_slice %11 {offsets = [0, 24], sizes = [8, 8], strides = [1, 1]} : vector<8x32xbf16> to vector<8x8xbf16>
    %cst_58 = arith.constant dense<0.000000e+00> : vector<8x8xf32>
    %102 = tpu.matmul %100, %101, %cst_58 {dimension_numbers = #tpu.dot_dimension_numbers<[1], [1], [0], [0], [0, 0, 1, 0], [], []>} : vector<8x8xbf16>, vector<8x8xbf16>, vector<8x8xf32> -> vector<8x8xf32>
    %c0_59 = arith.constant 0 : index
    %c3 = arith.constant 3 : index
    %103 = vector.load %arg15[%c0_59, %c3] : memref<8x4xf32, #tpu.memory_space<vmem>>, vector<8x1xf32>
    %cst_60 = arith.constant dense<0xFF800000> : vector<8xf32>
    %104 = vector.multi_reduction <maximumf>, %102, %cst_60 [1] : vector<8x8xf32> to vector<8xf32>
    %105 = vector.shape_cast %104 : vector<8xf32> to vector<8x1xf32>
    %106 = arith.maximumf %103, %105 : vector<8x1xf32>
    %107 = arith.subf %103, %106 : vector<8x1xf32>
    %108 = math.exp %107 : vector<8x1xf32>
    %109 = vector.broadcast %106 : vector<8x1xf32> to vector<8x8xf32>
    %110 = arith.subf %102, %109 : vector<8x8xf32>
    %111 = math.exp %110 : vector<8x8xf32>
    %c0_61 = arith.constant 0 : index
    %c3_62 = arith.constant 3 : index
    %112 = vector.load %arg16[%c0_61, %c3_62] : memref<8x4xf32, #tpu.memory_space<vmem>>, vector<8x1xf32>
    %113 = arith.mulf %108, %112 : vector<8x1xf32>
    %cst_63 = arith.constant dense<0.000000e+00> : vector<8xf32>
    %114 = vector.multi_reduction <add>, %111, %cst_63 [1] : vector<8x8xf32> to vector<8xf32>
    %115 = vector.shape_cast %114 : vector<8xf32> to vector<8x1xf32>
    %116 = arith.addf %113, %115 : vector<8x1xf32>
    %c0_64 = arith.constant 0 : index
    %c3_65 = arith.constant 3 : index
    %117 = vector.load %arg16[%c0_64, %c3_65] : memref<8x4xf32, #tpu.memory_space<vmem>>, vector<8x1xf32>
    tpu.vector_store %arg16[%c0_64, %c3_65], %116 {strides = array<i32>} : memref<8x4xf32, #tpu.memory_space<vmem>>, vector<8x1xf32>,
    %c0_66 = arith.constant 0 : index
    %c24 = arith.constant 24 : index
    %118 = vector.load %arg17[%c0_66, %c24] : memref<8x32xf32, #tpu.memory_space<vmem>>, vector<8x8xf32>
    %119 = vector.broadcast %108 : vector<8x1xf32> to vector<8x8xf32>
    %120 = arith.mulf %119, %118 : vector<8x8xf32>
    %121 = arith.truncf %111 : vector<8x8xf32> to vector<8x8xbf16>
    %122 = vector.extract_strided_slice %17 {offsets = [0, 24], sizes = [8, 8], strides = [1, 1]} : vector<8x32xbf16> to vector<8x8xbf16>
    %cst_67 = arith.constant dense<0.000000e+00> : vector<8x8xf32>
    %123 = tpu.matmul %121, %122, %cst_67 {dimension_numbers = #tpu.dot_dimension_numbers<[1], [0], [0], [1], [0, 0, 1, 1], [], []>} : vector<8x8xbf16>, vector<8x8xbf16>, vector<8x8xf32> -> vector<8x8xf32>
    %124 = arith.addf %120, %123 : vector<8x8xf32>
    %c0_68 = arith.constant 0 : index
    %c24_69 = arith.constant 24 : index
    %125 = vector.load %arg17[%c0_68, %c24_69] : memref<8x32xf32, #tpu.memory_space<vmem>>, vector<8x8xf32>
    tpu.vector_store %arg17[%c0_68, %c24_69], %124 {strides = array<i32>} : memref<8x32xf32, #tpu.memory_space<vmem>>, vector<8x8xf32>,
    %c0_70 = arith.constant 0 : index
    %c3_71 = arith.constant 3 : index
    %126 = vector.load %arg15[%c0_70, %c3_71] : memref<8x4xf32, #tpu.memory_space<vmem>>, vector<8x1xf32>
    tpu.vector_store %arg15[%c0_70, %c3_71], %106 {strides = array<i32>} : memref<8x4xf32, #tpu.memory_space<vmem>>, vector<8x1xf32>,
    %c0_i32_72 = arith.constant 0 : i32
    %127 = arith.cmpi eq, %arg2, %c0_i32_72 : i32
    %128 = arith.extui %127 : i1 to i32
    %c0_i32_73 = arith.constant 0 : i32
    %129 = arith.cmpi ne, %128, %c0_i32_73 : i32
    scf.if %129 {
      %c0_74 = arith.constant 0 : index
      %c0_75 = arith.constant 0 : index
      %130 = vector.load %arg16[%c0_74, %c0_75] : memref<8x4xf32, #tpu.memory_space<vmem>>, vector<8x1xf32>
      %cst_76 = arith.constant 5.65685415 : f32
      %131 = vector.broadcast %cst_76 : f32 to vector<8x1xf32>
      %132 = arith.mulf %130, %131 : vector<8x1xf32>
      %133 = tpu.reciprocal %132 : vector<8x1xf32> -> vector<8x1xf32>
      %c0_77 = arith.constant 0 : index
      %c0_78 = arith.constant 0 : index
      %134 = vector.load %arg17[%c0_77, %c0_78] : memref<8x32xf32, #tpu.memory_space<vmem>>, vector<8x8xf32>
      %135 = vector.broadcast %133 : vector<8x1xf32> to vector<8x8xf32>
      %136 = arith.mulf %134, %135 : vector<8x8xf32>
      %c0_79 = arith.constant 0 : index
      %c0_80 = arith.constant 0 : index
      %137 = vector.load %arg17[%c0_79, %c0_80] : memref<8x32xf32, #tpu.memory_space<vmem>>, vector<8x8xf32>
      tpu.vector_store %arg17[%c0_79, %c0_80], %136 {strides = array<i32>} : memref<8x32xf32, #tpu.memory_space<vmem>>, vector<8x8xf32>,
      %c0_81 = arith.constant 0 : index
      %c1_82 = arith.constant 1 : index
      %138 = vector.load %arg16[%c0_81, %c1_82] : memref<8x4xf32, #tpu.memory_space<vmem>>, vector<8x1xf32>
      %cst_83 = arith.constant 5.65685415 : f32
      %139 = vector.broadcast %cst_83 : f32 to vector<8x1xf32>
      %140 = arith.mulf %138, %139 : vector<8x1xf32>
      %141 = tpu.reciprocal %140 : vector<8x1xf32> -> vector<8x1xf32>
      %c0_84 = arith.constant 0 : index
      %c8_85 = arith.constant 8 : index
      %142 = vector.load %arg17[%c0_84, %c8_85] : memref<8x32xf32, #tpu.memory_space<vmem>>, vector<8x8xf32>
      %143 = vector.broadcast %141 : vector<8x1xf32> to vector<8x8xf32>
      %144 = arith.mulf %142, %143 : vector<8x8xf32>
      %c0_86 = arith.constant 0 : index
      %c8_87 = arith.constant 8 : index
      %145 = vector.load %arg17[%c0_86, %c8_87] : memref<8x32xf32, #tpu.memory_space<vmem>>, vector<8x8xf32>
      tpu.vector_store %arg17[%c0_86, %c8_87], %144 {strides = array<i32>} : memref<8x32xf32, #tpu.memory_space<vmem>>, vector<8x8xf32>,
      %c0_88 = arith.constant 0 : index
      %c2_89 = arith.constant 2 : index
      %146 = vector.load %arg16[%c0_88, %c2_89] : memref<8x4xf32, #tpu.memory_space<vmem>>, vector<8x1xf32>
      %cst_90 = arith.constant 5.65685415 : f32
      %147 = vector.broadcast %cst_90 : f32 to vector<8x1xf32>
      %148 = arith.mulf %146, %147 : vector<8x1xf32>
      %149 = tpu.reciprocal %148 : vector<8x1xf32> -> vector<8x1xf32>
      %c0_91 = arith.constant 0 : index
      %c16_92 = arith.constant 16 : index
      %150 = vector.load %arg17[%c0_91, %c16_92] : memref<8x32xf32, #tpu.memory_space<vmem>>, vector<8x8xf32>
      %151 = vector.broadcast %149 : vector<8x1xf32> to vector<8x8xf32>
      %152 = arith.mulf %150, %151 : vector<8x8xf32>
      %c0_93 = arith.constant 0 : index
      %c16_94 = arith.constant 16 : index
      %153 = vector.load %arg17[%c0_93, %c16_94] : memref<8x32xf32, #tpu.memory_space<vmem>>, vector<8x8xf32>
      tpu.vector_store %arg17[%c0_93, %c16_94], %152 {strides = array<i32>} : memref<8x32xf32, #tpu.memory_space<vmem>>, vector<8x8xf32>,
      %c0_95 = arith.constant 0 : index
      %c3_96 = arith.constant 3 : index
      %154 = vector.load %arg16[%c0_95, %c3_96] : memref<8x4xf32, #tpu.memory_space<vmem>>, vector<8x1xf32>
      %cst_97 = arith.constant 5.65685415 : f32
      %155 = vector.broadcast %cst_97 : f32 to vector<8x1xf32>
      %156 = arith.mulf %154, %155 : vector<8x1xf32>
      %157 = tpu.reciprocal %156 : vector<8x1xf32> -> vector<8x1xf32>
      %c0_98 = arith.constant 0 : index
      %c24_99 = arith.constant 24 : index
      %158 = vector.load %arg17[%c0_98, %c24_99] : memref<8x32xf32, #tpu.memory_space<vmem>>, vector<8x8xf32>
      %159 = vector.broadcast %157 : vector<8x1xf32> to vector<8x8xf32>
      %160 = arith.mulf %158, %159 : vector<8x8xf32>
      %c0_100 = arith.constant 0 : index
      %c24_101 = arith.constant 24 : index
      %161 = vector.load %arg17[%c0_100, %c24_101] : memref<8x32xf32, #tpu.memory_space<vmem>>, vector<8x8xf32>
      tpu.vector_store %arg17[%c0_100, %c24_101], %160 {strides = array<i32>} : memref<8x32xf32, #tpu.memory_space<vmem>>, vector<8x8xf32>,
      %c0_102 = arith.constant 0 : index
      %c0_103 = arith.constant 0 : index
      %162 = vector.load %arg17[%c0_102, %c0_103] : memref<8x32xf32, #tpu.memory_space<vmem>>, vector<8x32xf32>
      %163 = arith.truncf %162 : vector<8x32xf32> to vector<8x32xbf16>
      %c0_104 = arith.constant 0 : index
      %c0_105 = arith.constant 0 : index
      %164 = vector.load %arg11[%c0_104, %c0_105] : memref<32x32xbf16, #tpu.memory_space<vmem>>, vector<32x32xbf16>
      %cst_106 = arith.constant dense<0.000000e+00> : vector<8x32xf32>
      %165 = tpu.matmul %163, %164, %cst_106 {dimension_numbers = #tpu.dot_dimension_numbers<[1], [0], [0], [1], [0, 0, 1, 1], [], []>} : vector<8x32xbf16>, vector<32x32xbf16>, vector<8x32xf32> -> vector<8x32xf32>
      %c0_107 = arith.constant 0 : index
      %c0_108 = arith.constant 0 : index
      %166 = vector.load %arg12[%c0_107, %c0_108] : memref<1x32xf32, #tpu.memory_space<vmem>>, vector<1x32xf32>
      %167 = vector.broadcast %166 : vector<1x32xf32> to vector<8x32xf32>
      %168 = arith.addf %165, %167 : vector<8x32xf32>
      %c0_109 = arith.constant 0 : index
      %c0_110 = arith.constant 0 : index
      %c0_111 = arith.constant 0 : index
      %169 = vector.load %arg3[%c0_109, %c0_110, %c0_111] : memref<1x8x32xf32, #tpu.memory_space<vmem>>, vector<1x8x32xf32>
      %170 = vector.shape_cast %169 : vector<1x8x32xf32> to vector<8x32xf32>
      %171 = arith.addf %170, %168 : vector<8x32xf32>
      %c0_112 = arith.constant 0 : index
      %c0_113 = arith.constant 0 : index
      %c0_114 = arith.constant 0 : index
      %172 = vector.load %arg13[%c0_112, %c0_113, %c0_114] : memref<1x8x32xf32, #tpu.memory_space<vmem>>, vector<1x8x32xf32>
      %173 = vector.shape_cast %172 : vector<1x8x32xf32> to vector<8x32xf32>
      %174 = vector.shape_cast %171 : vector<8x32xf32> to vector<1x8x32xf32>
      tpu.vector_store %arg13[%c0_112, %c0_113, %c0_114], %174 {strides = array<i32>} : memref<1x8x32xf32, #tpu.memory_space<vmem>>, vector<1x8x32xf32>,
    } else {
    }
    return
  }
  func.func @transform_0(%arg0: i32, %arg1: i32, %arg2: i32) -> (i32, i32, i32) {
    %c0_i32 = arith.constant 0 : i32
    %c0_i32_0 = arith.constant 0 : i32
    return %arg0, %arg1, %c0_i32 : i32, i32, i32
  }
  func.func @transform_1(%arg0: i32, %arg1: i32, %arg2: i32) -> (i32, i32, i32) {
    %c0_i32 = arith.constant 0 : i32
    %c0_i32_0 = arith.constant 0 : i32
    return %arg0, %arg2, %c0_i32 : i32, i32, i32
  }
  func.func @transform_2(%arg0: i32, %arg1: i32, %arg2: i32) -> (i32, i32) {
    %c0_i32 = arith.constant 0 : i32
    %c0_i32_0 = arith.constant 0 : i32
    %c0_i32_1 = arith.constant 0 : i32
    return %c0_i32, %c0_i32_0 : i32, i32
  }
  func.func @transform_3(%arg0: i32, %arg1: i32, %arg2: i32) -> (i32, i32) {
    %c0_i32 = arith.constant 0 : i32
    %c0_i32_0 = arith.constant 0 : i32
    %c0_i32_1 = arith.constant 0 : i32
    return %c0_i32, %c0_i32_0 : i32, i32
  }
  func.func @transform_4(%arg0: i32, %arg1: i32, %arg2: i32) -> (i32, i32) {
    %c0_i32 = arith.constant 0 : i32
    %c0_i32_0 = arith.constant 0 : i32
    %c0_i32_1 = arith.constant 0 : i32
    return %c0_i32, %c0_i32_0 : i32, i32
  }
  func.func @transform_5(%arg0: i32, %arg1: i32, %arg2: i32) -> (i32, i32) {
    %c0_i32 = arith.constant 0 : i32
    %c0_i32_0 = arith.constant 0 : i32
    %c0_i32_1 = arith.constant 0 : i32
    return %c0_i32, %c0_i32_0 : i32, i32
  }
  func.func @transform_6(%arg0: i32, %arg1: i32, %arg2: i32) -> (i32, i32) {
    %c0_i32 = arith.constant 0 : i32
    %c0_i32_0 = arith.constant 0 : i32
    %c0_i32_1 = arith.constant 0 : i32
    return %c0_i32, %c0_i32_0 : i32, i32
  }
  func.func @transform_7(%arg0: i32, %arg1: i32, %arg2: i32) -> (i32, i32) {
    %c0_i32 = arith.constant 0 : i32
    %c0_i32_0 = arith.constant 0 : i32
    %c0_i32_1 = arith.constant 0 : i32
    return %c0_i32, %c0_i32_0 : i32, i32
  }
  func.func @transform_8(%arg0: i32, %arg1: i32, %arg2: i32) -> (i32, i32) {
    %c0_i32 = arith.constant 0 : i32
    %c0_i32_0 = arith.constant 0 : i32
    %c0_i32_1 = arith.constant 0 : i32
    return %c0_i32, %c0_i32_0 : i32, i32
  }
  func.func @transform_9(%arg0: i32, %arg1: i32, %arg2: i32) -> (i32, i32) {
    %c0_i32 = arith.constant 0 : i32
    %c0_i32_0 = arith.constant 0 : i32
    %c0_i32_1 = arith.constant 0 : i32
    return %c0_i32, %c0_i32_0 : i32, i32
  }
  func.func @transform_10(%arg0: i32, %arg1: i32, %arg2: i32) -> (i32, i32, i32) {
    %c0_i32 = arith.constant 0 : i32
    %c0_i32_0 = arith.constant 0 : i32
    return %arg0, %arg1, %c0_i32 : i32, i32, i32
  }
}

</mosaic_0001>

<bundles_post_ra>
// kernel: tpu_custom_call.1
= control target key start
LH: loop header
LB: loop body
LE: loop exit
PB: predicated region body
PF: predicated region fallthrough
CT: control target
= control target key end

     0   :  { %s2179_s0 = inlined_call_operand.hbm [shape: f32[2,8,32], index: 0, kind: input, shape index: {}]   ;;  %s2180_s1 = inlined_call_operand.hbm [shape: f32[2,8,32], index: 1, kind: input, shape index: {}]   ;;  %s2181_s2 = inlined_call_operand.hbm [shape: bf16[32,32], index: 2, kind: input, shape index: {}]   ;;  %s2182_s3 = inlined_call_operand.hbm [shape: bf16[32,32], index: 3, kind: input, shape index: {}]   ;;  %s2183_s4 = inlined_call_operand.hbm [shape: bf16[32,32], index: 4, kind: input, shape index: {}]   ;;  %s2184_s5 = inlined_call_operand.vmem [shape: f32[1,32], index: 5, kind: input, shape index: {}]   ;;  %s2185_s6 = inlined_call_operand.vmem [shape: f32[1,32], index: 6, kind: input, shape index: {}]   ;;  %s2186_s7 = inlined_call_operand.vmem [shape: f32[1,32], index: 7, kind: input, shape index: {}]   ;;  %s2187_s8 = inlined_call_operand.hbm [shape: bf16[32,32], index: 8, kind: input, shape index: {}]   ;;  %s2188_s9 = inlined_call_operand.vmem [shape: f32[1,32], index: 9, kind: input, shape index: {}]   ;;  %s2189_s10 = inlined_call_operand.hbm [shape: f32[2,8,32], index: 10, kind: output, shape index: {}]  }
   0x1   :  { %2197 = sst [smem:[#allocation31_spill]] %s2181_s2 }
   0x2   :  { %2198 = sst [smem:[#allocation32_spill]] %s2182_s3 }
   0x3   :  { %2199 = sst [smem:[#allocation33_spill]] %s2183_s4 }
   0x4   :  { %2200 = sst [smem:[#allocation34_spill]] %s2187_s8 }
   0x5   :  { %15 = vsyncpa [#allocation7], 0 }
   0x6   :  { %17 = vsyncpa [#allocation7 + $0x1], 0 }
   0x7   :  { %18 = vsyncpa [#allocation10], 0 }
   0x8   :  { %20 = vsyncpa [#allocation10 + $0x1], 0 }
   0x9   :  { %21 = vsyncpa [#allocation13], 0 }
   0xa   :  { %22 = vsyncpa [#allocation16], 0 }
   0xb   :  { %23 = vsyncpa [#allocation8], 0 }
   0xc   :  { %25 = vsyncpa [#allocation8 + $0x1], 0  ;;  %s1858_s13 = smov 0   ;;  %s1860_s14 = smov 0  }
   0xd   :  { %s1862_s15 = smov 0   ;;  %s1864_s16 = smov 0  }
   0xe   :  { %s1866_s17 = smov 0   ;;  %s1868_s18 = smov 0  }
   0xf LB: > { %2201 = sst [smem:[#allocation24_spill]] %s1763_s13  ;;  %s1889_s19 = sadd.s32 4294967295, %s1783_s18   ;;  %s1783_s18 = sphi %s1868_s18, %s31_s18   ;;  %s1779_s17 = sphi %s1866_s17, %s2224_s17   ;;  %s1775_s16 = sphi %s1864_s16, %s2223_s16   ;;  %s1771_s15 = sphi %s1862_s15, %s2222_s15   ;;  %s1767_s14 = sphi %s1860_s14, %s2226_s14   ;;  %s1763_s13 = sphi %s1858_s13, %s2225_s13  }
  0x10   : > { %2202 = sst [smem:[#allocation25_spill]] %s1771_s15  ;;  %p1275_p0 = scmp.ge.s32.totalorder %s1783_s18, 1 }
  0x11   : > { %2203 = sst [smem:[#allocation26_spill]] %s1779_s17  ;;  %p73_p1 = scmp.eq.s32.totalorder %s1889_s19, 0 }
  0x12   : > { %p307_p2 = scmp.lt.s32.totalorder %s1783_s18, 3  ;;  %s2204_s2 = sld [smem:[#allocation31_spill]] }
  0x13   : > { %s1785_s24 = smov [#allocation11]   ;;  %p1280_p6 = scmp.ge.s32.totalorder %s1783_s18, 2 }
  0x14   : > { %p1897_p3 = pnand %p1275_p0, %p307_p2  ;;  %s320_s25 = sshll.u32 %s1785_s24, 4  ;;  %s321_s25 = int_to_ptr.vmem [resolvable:$true] %s320_s25 }
  0x15   : > { %s2207_s3 = sld [smem:[#allocation32_spill]]  ;;  %s1786_s30 = smov 64  }
  0x16   : > { %p1371_p4 = pneg %p1897_p3  ;;  %s1787_s11 = smov 4  }
  0x17   : > { %s1788_s12 = smov [#allocation12]   ;;  %s2208_s4 = sld [smem:[#allocation33_spill]] }
  0x18   : > { %s318_s22 = sshll.u32 %s2204_s2, 4  ;;  %p1905_p5 = pnand %p1371_p4, %p73_p1  ;;  %s319_s22 = int_to_ptr.hbm [resolvable:$true] %s318_s22 }
  0x19   : > { %s334_s20 = sshll.u32 %s1788_s12, 4  ;;  %s2209_s8 = sld [smem:[#allocation34_spill]]  ;;  %s335_s20 = int_to_ptr.vmem [resolvable:$true] %s334_s20 }
  0x1a   : > { %1374 = dma.hbm_to_vmem [thread:$0]  (!%p1905_p5), %s319_s22, 256, %s321_s25, [#allocation10], %s1786_s30, %s1786_s30, %s1787_s11  }
  0x1b   : > { %s332_s29 = sshll.u32 %s2207_s3, 4  ;;  %s1789_s25 = smov [#allocation14]   ;;  %s333_s29 = int_to_ptr.hbm [resolvable:$true] %s332_s29 }
  0x1c   : > { %1377 = dma.hbm_to_vmem [thread:$0]  (!%p1905_p5), %s333_s29, 256, %s335_s20, [#allocation13], %s1786_s30, %s1786_s30, %s1787_s11  }
  0x1d   : > { %s346_s2 = sshll.u32 %s2208_s4, 4  ;;  %s348_s3 = sshll.u32 %s1789_s25, 4  ;;  %s347_s2 = int_to_ptr.hbm [resolvable:$true] %s346_s2  ;;  %s349_s3 = int_to_ptr.vmem [resolvable:$true] %s348_s3 }
  0x1e   : > { %1380 = dma.hbm_to_vmem [thread:$0]  (!%p1905_p5), %s347_s2, 256, %s349_s3, [#allocation13], %s1786_s30, %s1786_s30, %s1787_s11  }
  0x1f   : > { %s369_s22 = sshll.u32 %s2209_s8, 4  ;;  %s1790_s12 = smov [#allocation15]   ;;  %s370_s22 = int_to_ptr.hbm [resolvable:$true] %s369_s22 }
  0x20   : > { %s371_s21 = sshll.u32 %s1790_s12, 4  ;;  %s1274_s29 = sadd.s32 4294967294, %s1783_s18   ;;  %s372_s21 = int_to_ptr.vmem [resolvable:$true] %s371_s21 }
  0x21   : > { %1383 = dma.hbm_to_vmem [thread:$0]  (!%p1905_p5), %s370_s22, 256, %s372_s21, [#allocation16], %s1786_s30, %s1786_s30, %s1787_s11  }
  0x22   : > { %s50_s20 = sadd.s32 1, %s1779_s17  ;;  %s59_s24 = sadd.s32 1, %s1771_s15 }
  0x23   : > { %p52_p7 = scmp.ge.s32.totalorder %s50_s20, 2  ;;  %p66_p8 = scmp.ne.s32.totalorder %s1771_s15, %s1767_s14 }
  0x24   : > { %p67_p9 = scmp.eq.s32.totalorder %s1783_s18, 0  ;;  %p72_p11 = scmp.ne.s32.totalorder %s1767_s14, %s1763_s13 }
  0x25   : > { %s2228_s20 = smov (%p52_p7, %s50_s20), 0  ;;  %p294_p12 = scmp.eq.s32.totalorder %s1889_s19, 1 }
  0x26   : > { %2210 = sst [smem:[#allocation27_spill]] %s2228_s20  ;;  %p1935_p10 = por %p67_p9, %p66_p8 }
  0x27   : > { %s54_s3 = ssub.s32 %s1779_s17, %s2228_s20  ;;  %p1946_p0 = por %p73_p1, %p72_p11 }
  0x28   : > { %p57_p13 = scmp.eq.s32.totalorder %s54_s3, 0  ;;  %p1950_p2 = por %p294_p12, %p66_p8 }
  0x29   : > { %p300_p4 = scmp.eq.s32.totalorder %s1274_s29, 1  ;;  %p1399_p7 = scmp.lt.s32.totalorder %s1783_s18, 2 }
  0x2a   : > { %s2213_s30 = scalar_select %p1950_p2, 1, 0 }
  0x2b   : > { %s1955_s11 = scalar_select %p57_p13, %s1771_s15, %s59_s24  }
  0x2c   : > { %2214 = sst [smem:[#allocation28_spill]] %s2213_s30  ;;  %p1957_p5 = por %p300_p4, %p72_p11 }
  0x2d   : > { %2215 = sst [smem:[#allocation29_spill]] %s1955_s11  ;;  %s388_s28 = sand.u32 1, %s1771_s15  }
  0x2e   : > { %s2216_s27 = scalar_select %p1957_p5, 1, 0 }
  0x2f   : > { %s1282_s22 = sshll.u32 %s1779_s17, 3  ;;  %s1281_s25 = sshll.u32 %s388_s28, 3 }
  0x30   : > { %2217 = sst [smem:[#allocation30_spill]] %s2216_s27  ;;  %s397_s3 = scalar_lea.hbm %s2179_s0, %s1282_s22 }
  0x31   : > { %s399_s4 = sshll.u32 %s397_s3, 4  ;;  %s392_s8 = scalar_lea.vmem [#allocation6], %s1281_s25  ;;  %s400_s4 = int_to_ptr.hbm [resolvable:$true] %s399_s4 }
  0x32   : > { %s401_s20 = sshll.u32 %s392_s8, 4  ;;  %p1385_p8 = pnand %p1399_p7, %p1935_p10  ;;  %s402_s20 = int_to_ptr.vmem [resolvable:$true] %s401_s20 }
  0x33   : > { %s417_s11 = scalar_lea.hbm %s2180_s1, %s1282_s22  ;;  %s408_s27 = sand.u32 1, %s1783_s18  }
  0x34   : > { %s389_s13 = scalar_lea.sflag [#allocation7], %s388_s28  ;;  %s419_s17 = sshll.u32 %s417_s11, 4  ;;  %s420_s17 = int_to_ptr.hbm [resolvable:$true] %s419_s17 }
  0x35   : > { %1387 = dma.hbm_to_vmem [thread:$0]  (!%p1385_p8), %s400_s4, 128, %s402_s20, %s389_s13  }
  0x36   : > { %s412_s15 = scalar_lea.vmem [#allocation9], %s1281_s25  ;;  %s409_s12 = scalar_lea.sflag [#allocation10], %s408_s27 }
  0x37   : > { %s421_s30 = sshll.u32 %s412_s15, 4  ;;  %430 = sbr.rel (%p1897_p3) target bundleno = 1175 (0x497), region = 60  ;;  %s422_s30 = int_to_ptr.vmem [resolvable:$true] %s421_s30 }
  0x38   : > { %1390 = dma.hbm_to_vmem [thread:$0]  (!%p1385_p8), %s420_s17, 128, %s422_s30, %s409_s12  }
  0x39   : > { %s1976_s8 = sand.u32 (!%p1897_p3), 1, %s1767_s14  }
  0x3a   : > { %s1979_s2 = sshll.u32 (!%p1897_p3), %s1976_s8, 3  ;;  %s433_s4 = scalar_lea.sflag (!%p1897_p3), [#allocation7], %s1976_s8 }
  0x3b   : > { %s436_s13 = scalar_lea.vmem (!%p1897_p3), [#allocation6], %s1979_s2 }
  0x3c   : > { %1738 = dma.done.wait (%p1946_p0), %s433_s4, 128  }
  0x3d   : > { %1740 = vsyncadd (%p1946_p0), %s433_s4, 4294967168  ;;  %s442_s15 = sand.u32 1, %s1889_s19   ;;  %s446_s23 = scalar_lea.vmem [#allocation9], %s1979_s2 }
  0x3e   : > { %s443_s17 = scalar_lea.sflag [#allocation10], %s442_s15 }
  0x3f   : > { %1742 = dma.done.wait (%p1946_p0), %s443_s17, 128  }
  0x40   : > { %1744 = vsyncadd (%p1946_p0), %s443_s17, 4294967168 }
  0x41   : > { %1746 = dma.done.wait (%p73_p1), [#allocation10], 256  }
  0x42   : > { %1748 = vsyncadd (%p73_p1), [#allocation10], 4294967040 }
  0x43   : > { %1750 = dma.done.wait (%p73_p1), [#allocation13], 512  }
  0x44   : > { %1752 = vsyncadd (%p73_p1), [#allocation13], 4294966784 }
  0x45   : > { %1754 = dma.done.wait (%p73_p1), [#allocation16], 256  }
  0x46   : > { %1756 = vsyncadd (%p73_p1), [#allocation16], 4294967040  ;;  %v1342_v0 = vld [vmem:[#allocation11 + $0x8] sm:$0xff]  ;;  %v1344_v1 = vld [vmem:[#allocation12 + $0x8] sm:$0xff]  ;;  %vm536_vm0 = vcmask 261120   ;;  %vm554_vm1 = vcmask 257024  }
  0x47   : > { %v1341_v2 = vld [vmem:[#allocation11] sm:$0xff]  ;;  %v1343_v3 = vld [vmem:[#allocation12] sm:$0xff]  ;;  %546 = vmatpush.bf16.msra.mxu0 %v1342_v0  ;;  %592 = vmatpush.bf16.msra.mxu1 %v1344_v1  ;;  %vm635_vm2 = vcmask 64512   ;;  %s1791_s11 = smov 104   ;;  %s1792_s27 = smov 112   ;;  %v1346_v24 = vld [vmem:[#allocation14 + $0x8] sm:$0xff] }
  0x48   : > { %v2005_v4 = vld [vmem:[%s436_s13] sm:$0xff]  ;;  %v560_v5 = vld [vmem:[%s446_s23] sm:$0xff]  ;;  %s1793_s28 = smov 120   ;;  %626 = vmatpush.bf16.msra.mxu2 %v1346_v24  ;;  %vm556_vm3 = vcmask 31744   ;;  %v1794_v38 = vmov -inf   ;;  %v1795_v39 = vmov 0.0  }
  0x49   : > { %v515_v6 = vpack.c.bf16 %v2005_v4, %v2005_v4  ;;  %v561_v7 = vpack.c.bf16 %v560_v5, %v560_v5  ;;  %v1483_v8 = vld [vmem:[%s2184_s5] ss:$0 sm:$0xff]  ;;  %557 = vst.msk [vmem:[#allocation3] sm:$0xff] %vm556_vm3, %v1794_v38  ;;  %v1796_v40 = vmov 0   ;;  %vm677_vm4 = vcmask 7168   ;;  %s1800_s21 = smov 8  }
  0x4a   : > { %v1484_v9 = vld [vmem:[%s2185_s6] ss:$0 sm:$0xff]  ;;  %558 = vst.msk [vmem:[#allocation4] sm:$0xff] %vm556_vm3, %v1795_v39  ;;  %1472 = vset.pattern.permute.xlu1 %v1796_v40  ;;  %v1797_v54 = vmov 1   ;;  %v1798_v60 = vmov 2   ;;  %v1799_v63 = vmov 3  }
  0x4b   : > { %547 = vmatpush.bf16.msra.mxu0 %v1341_v2  ;;  %593 = vmatpush.bf16.msra.mxu1 %v1343_v3  ;;  %v1345_v25 = vld [vmem:[#allocation14] sm:$0xff]  ;;  %559 = vst.msk [vmem:[#allocation5] sm:$0xff] %vm536_vm0, %v1795_v39  ;;  %vm690_vm5 = vcmask 1043456   ;;  %vm761_vm6 = vcmask 15368   ;;  %vm848_vm7 = vcmask 23568   ;;  %vm932_vm8 = vcmask 31768  }
  0x4c   : > { %627 = vmatpush.bf16.msra.mxu2 %v1345_v25  ;;  %1471 = vset.pattern.permute.xlu0 %v1797_v54  ;;  %v1485_v55 = vld [vmem:[%s2186_s7] ss:$0 sm:$0xff]  ;;  %s1801_s3 = smov 16   ;;  %s1802_s29 = smov 24   ;;  %vm800_vm13 = vcmask 130112   ;;  %vm884_vm14 = vcmask 195712  }
  0x4d   : > { %1474 = vset.pattern.permute.xlu2 %v1799_v63  ;;  %vm968_vm15 = vcmask 261312   ;;  %s1338_s24 = sshll.u32 %s1775_s16, 3  ;;  %s508_s19 = scalar_lea.vmem [#allocation17], %s1979_s2 }
  0x4e   : > { %1301 = vmatmul.msk.bf16.vlgmr.msra.gmra.mxu0 %vm536_vm0, %v515_v6  ;;  %1310 = vmatmul.msk.bf16.vlgmr.msra.gmra.mxu1 %vm536_vm0, %v561_v7  ;;  %s1123_s23 = scalar_lea.hbm %s2189_s10, %s1338_s24  ;;  %s1125_s20 = sshll.u32 %s508_s19, 4  ;;  %s1126_s20 = int_to_ptr.vmem [resolvable:$true] %s1125_s20 }
  0x4f   : > { %1319 = vmatmul.msk.bf16.vlgmr.msra.gmra.mxu2 %vm536_vm0, %v561_v7  ;;  %s1127_s26 = sshll.u32 %s1123_s23, 4  ;;  %s1112_s16 = scalar_lea.sflag [#allocation8], %s1976_s8  ;;  %s1128_s26 = int_to_ptr.hbm [resolvable:$true] %s1127_s26 }
  0x50   : > { %v2041_v43 = vld [vmem:[#allocation3] sm:$0xff]  ;;  %s1699_s30 = sshra.s32 %s1128_s26, 4  ;;  %s1705_s2 = scalar_lea.hbm %s2189_s10, 16  ;;  %s1700_s30 = int_to_ptr.hbm [resolvable:$true] %s1699_s30 }
  0x51   : > { %p1706_p10 = scmp.lt.s32.totalorder %s1700_s30, %s2189_s10 }
  0xcb   : > { %v549_v10 = vpop.f32.mrf.mxu0  ;;  %v595_v11 = vpop.f32.mrf.mxu1 }
  0xcc   : > { %v550_v12 = vadd.f32 %v1483_v8, %v549_v10  ;;  %v596_v13 = vadd.f32 %v1484_v9, %v595_v11 }
  0xce   : > { %v553_v14 = vpack.c.bf16 %v550_v12, %v550_v12  ;;  %v599_v15 = vpack.c.bf16 %v596_v13, %v596_v13 }
  0xd0   : > { %555 = vst.msk [vmem:[#allocation2] sm:$0xf] %vm554_vm1, %v553_v14  ;;  %v716_v16 = vunpack.c.l.b16 %v599_v15  ;;  %v640_v17 = vsel %vm635_vm2, %v599_v15, 0 }
  0xd1   : > { %649 = vmatpush.bf16.xpose.msra.mxu3 %v640_v17 }
  0xd2   : > { %v717_v18 = vpack.c.b16 %v716_v16, %v716_v16  ;;  %v629_v56 = vpop.f32.mrf.mxu2 }
  0xd3   : > { %v551_v19 = vpop.f32.mrf.mxu0  ;;  %v597_v20 = vpop.f32.mrf.mxu1  ;;  %v630_v57 = vadd.f32 %v1485_v55, %v629_v56 }
  0xd4   : > { %889 = vrot.lane.b32.xlu2 %v717_v18, %s1791_s11  ;;  %805 = vrot.lane.b32.xlu1 %v717_v18, %s1792_s27 }
  0xd5   : > { %718 = vrot.lane.b32.xlu0 %v717_v18, %s1793_s28  ;;  %v633_v58 = vpack.c.bf16 %v630_v57, %v630_v57 }
  0xd7   : > { %v634_v21 = vld [vmem:[#allocation2] sm:$0xf]  ;;  %v772_v59 = vunpack.c.l.b16 %v633_v58  ;;  %v692_v0 = vsel %vm690_vm5, %v633_v58, 0 }
  0xd8   : > { %1320 = vmatmul.msk.bf16.vlgmr.msra.gmra.mxu3 %vm635_vm2, %v634_v21  ;;  %v711_v22 = vunpack.c.l.b16 %v634_v21  ;;  %701 = vmatpush.bf16.msrb.mxu0 %v692_v0 }
  0xd9   : > { %v773_v61 = vpack.c.b16 %v772_v59, %v772_v59 }
  0xda   : > { %v712_v23 = vpack.c.b16 %v711_v22, %v711_v22  ;;  %v631_v62 = vpop.f32.mrf.mxu2 }
  0xdc   : > { %803 = vrot.lane.b32.xlu1 %v712_v23, %s1792_s27  ;;  %887 = vrot.lane.b32.xlu2 %v712_v23, %s1791_s11 }
  0xdd   : > { %713 = vrot.lane.b32.xlu0 %v712_v23, %s1793_s28 }
 0x12e   : > { %v890_v26 = vpop.permute.xlu2 %889 }
 0x12f   : > { %v895_v31 = vsel %vm635_vm2, %v890_v26, 0 }
 0x136   : > { %v888_v36 = vpop.permute.xlu2 %887 }
 0x146   : > { %v806_v27 = vpop.permute.xlu1 %805 }
 0x147   : > { %v719_v28 = vpop.permute.xlu0 %718  ;;  %v811_v29 = vsel %vm635_vm2, %v806_v27, 0 }
 0x148   : > { %v724_v30 = vsel %vm635_vm2, %v719_v28, 0  ;;  %820 = vmatpush.bf16.xpose.msrb.mxu3 %v811_v29 }
 0x149   : > { %733 = vmatpush.bf16.xpose.msrb.mxu1 %v724_v30 }
 0x14e   : > { %v804_v32 = vpop.permute.xlu1 %803 }
 0x14f   : > { %v714_v33 = vpop.permute.xlu0 %713  ;;  %1324 = vmatmul.msk.bf16.vlgmr.msrb.gmra.mxu3 %vm635_vm2, %v804_v32 }
 0x150   : > { %1322 = vmatmul.msk.bf16.vlgmr.msrb.gmra.mxu1 %vm635_vm2, %v714_v33 }
 0x151   : > { %904 = vmatpush.bf16.xpose.msra.mxu1 %v895_v31 }
 0x15b   : > { %v2031_v34 = vpop.f32.mrf.mxu3 }
 0x15c   : > { %v656_v35 = vsel %vm635_vm2, %v2031_v34, -inf }
 0x15d   : > { %657 = vmax.xlane.f32.xlu0 %v656_v35 }
 0x160   : > { %1326 = vmatmul.msk.bf16.vlgmr.msra.gmra.mxu1 %vm635_vm2, %v888_v36 }
 0x163   : > { %v653_v37 = vpop.f32.mrf.mxu3 }
 0x1cd   : > { %v2037_v41 = vpop.f32.mrf.mxu1 }
 0x1ce   : > { %v740_v42 = vsel %vm635_vm2, %v2037_v41, -inf }
 0x1cf   : > { %741 = vmax.xlane.f32.xlu1 %v740_v42 }
 0x1d0   : > { %v658_v44 = vpop.xlane.xlu0 %657 }
 0x1d1   : > { %v2044_v45 = vmax.f32 %v2041_v43, %v658_v44 }
 0x1d2   : > { %v2046_v46 = vpop.f32.mrf.mxu3 }
 0x1d3   : > { %v827_v47 = vsel %vm635_vm2, %v2046_v46, -inf  ;;  %v660_v48 = vsub.f32 %v2041_v43, %v2044_v45  ;;  %709 = vst.msk [vmem:[#allocation3] sm:$0xff] %vm677_vm4, %v2044_v45 }
 0x1d4   : > { %828 = vmax.xlane.f32.xlu2 %v827_v47 }
 0x1d5   : > { %v737_v49 = vpop.f32.mrf.mxu1  ;;  %v661_v44 = vmul.f32 1.442695, %v660_v48 }
 0x1da   : > { %v824_v50 = vpop.f32.mrf.mxu3  ;;  %v2064_v2 = vld [vmem:[#allocation3] sm:$0xff] }
 0x1dd   : > { %v906_v51 = vpop.f32.mrf.mxu1 }
 0x1de   : > { %v911_v52 = vsel %vm635_vm2, %v906_v51, -inf }
 0x1df   : > { %912 = vmax.xlane.f32.xlu2 %v911_v52 }
 0x1e5   : > { %v908_v53 = vpop.f32.mrf.mxu1 }
 0x1e8   : > { %665 = vperm.xlu1 %1472, %v2044_v45  }
 0x1f0   : > { %1473 = vset.pattern.permute.xlu1 %v1798_v60 }
 0x1f7   : > { %774 = vrot.lane.b32.xlu2 %v773_v61, %s1793_s28 }
 0x242   : > { %v742_v1 = vpop.xlane.xlu1 %741 }
 0x243   : > { %v2067_v3 = vmax.f32 %v2064_v2, %v742_v1 }
 0x245   : > { %v744_v5 = vsub.f32 %v2064_v2, %v2067_v3  ;;  %802 = vst.msk [vmem:[#allocation3] sm:$0xff] %vm761_vm6, %v2067_v3  ;;  %749 = vperm.xlu0 %1471, %v2067_v3  }
 0x247   : > { %v829_v7 = vpop.xlane.xlu2 %828  ;;  %v745_v47 = vmul.f32 1.442695, %v744_v5 }
 0x24c   : > { %v2074_v6 = vld [vmem:[#allocation3] sm:$0xff] }
 0x24d   : > { %v2077_v8 = vmax.f32 %v2074_v6, %v829_v7  ;;  %1479 = vset.pattern.permute.xlu0 %v1796_v40 }
 0x24f   : > { %v831_v9 = vsub.f32 %v2074_v6, %v2077_v8  ;;  %886 = vst.msk [vmem:[#allocation3] sm:$0xff] %vm848_vm7, %v2077_v8  ;;  %836 = vperm.xlu1 %1473, %v2077_v8   ;;  %v679_v8 = vld [vmem:[#allocation5] sm:$0xff] }
 0x251   : > { %v832_v49 = vmul.f32 1.442695, %v831_v9 }
 0x252   : > { %v913_v11 = vpop.xlane.xlu2 %912 }
 0x256   : > { %v2084_v10 = vld [vmem:[#allocation3] sm:$0xff] }
 0x257   : > { %v2087_v12 = vmax.f32 %v2084_v10, %v913_v11  ;;  %858 = vrot.lane.b32.xlu1 %v773_v61, %s1792_s27 }
 0x258   : > { %1475 = vset.pattern.permute.xlu1 %v1796_v40 }
 0x259   : > { %v915_v13 = vsub.f32 %v2084_v10, %v2087_v12  ;;  %970 = vst.msk [vmem:[#allocation3] sm:$0xff] %vm932_vm8, %v2087_v12  ;;  %920 = vperm.xlu2 %1474, %v2087_v12  }
 0x25a   : > { %v666_v14 = vpop.permute.xlu1 %665  ;;  %v775_v20 = vpop.permute.xlu2 %774 }
 0x25b   : > { %v668_v15 = vsub.f32 %v2031_v34, %v666_v14  ;;  %v780_v21 = vsel %vm690_vm5, %v775_v20, 0  ;;  %v916_v43 = vmul.f32 1.442695, %v915_v13 }
 0x25c   : > { %789 = vmatpush.bf16.msrb.mxu2 %v780_v21 }
 0x25d   : > { %v669_v16 = vmul.f32 1.442695, %v668_v15 }
 0x25f   : > { %1487 = vpow2.f32 %v669_v16 }
 0x261   : > { %942 = vrot.lane.b32.xlu2 %v773_v61, %s1791_s11  ;;  %s1701_s11 = scalar_lea.hbm %s1700_s30, 8 }
 0x262   : > { %1476 = vset.pattern.permute.xlu2 %v1797_v54  ;;  %p1702_p1 = scmp.ne.s32.totalorder %s1700_s30, %s1701_s11  ;;  %p1707_p11 = scmp.lt.s32.totalorder %s1705_s2, %s1701_s11 }
 0x264   : > { %p1703_p3 = pnand %p1702_p1, %p1950_p2  ;;  %p1708_p12 = por %p1707_p11, %p1706_p10 }
 0x265   : > { %v1488_v17 = vpop.eup %1487 }
 0x266   : > { %v686_v18 = vpack.c.bf16 %v1488_v17, %v1488_v17  ;;  %v673_v19 = vsel %vm635_vm2, %v1488_v17, 0.0  ;;  %p1704_p9 = pneg %p1703_p3 }
 0x268   : > { %1321 = vmatmul.msk.bf16.vlgmr.msrb.gmra.mxu0 %vm635_vm2, %v686_v18  ;;  %p1709_p13 = pnand %p1708_p12, %p1704_p9 }
 0x26f   : > { %674 = vadd.xlane.f32.xlu0 %v673_v19 }
 0x2b3   : > { %v921_v22 = vpop.permute.xlu2 %920 }
 0x2b4   : > { %v923_v23 = vsub.f32 %v906_v51, %v921_v22  ;;  %v671_v51 = vld [vmem:[#allocation4] sm:$0xff] }
 0x2b6   : > { %v924_v24 = vmul.f32 1.442695, %v923_v23 }
 0x2b7   : > { %v750_v25 = vpop.permute.xlu0 %749 }
 0x2b8   : > { %1489 = vpow2.f32 %v924_v24  ;;  %v752_v26 = vsub.f32 %v2037_v41, %v750_v25 }
 0x2ba   : > { %v753_v27 = vmul.f32 1.442695, %v752_v26 }
 0x2bb   : > { %v943_v28 = vpop.permute.xlu2 %942 }
 0x2bc   : > { %1491 = vpow2.f32 %v753_v27  ;;  %v948_v29 = vsel %vm690_vm5, %v943_v28, 0 }
 0x2bd   : > { %957 = vmatpush.bf16.msra.mxu2 %v948_v29 }
 0x2be   : > { %v1490_v30 = vpop.eup %1489 }
 0x2bf   : > { %v928_v31 = vsel %vm635_vm2, %v1490_v30, 0.0 }
 0x2c0   : > { %929 = vadd.xlane.f32.xlu0 %v928_v31 }
 0x2c1   : > { %v837_v32 = vpop.permute.xlu1 %836 }
 0x2c2   : > { %v1492_v33 = vpop.eup %1491  ;;  %v839_v34 = vsub.f32 %v2046_v46, %v837_v32  ;;  %v941_v46 = vpack.c.bf16 %v1490_v30, %v1490_v30 }
 0x2c3   : > { %v757_v35 = vsel %vm635_vm2, %v1492_v33, 0.0  ;;  %v770_v36 = vpack.c.bf16 %v1492_v33, %v1492_v33 }
 0x2c4   : > { %v840_v37 = vmul.f32 1.442695, %v839_v34  ;;  %758 = vadd.xlane.f32.xlu1 %v757_v35 }
 0x2c5   : > { %1323 = vmatmul.msk.bf16.vlgmr.msrb.gmra.mxu2 %vm635_vm2, %v770_v36 }
 0x2c6   : > { %1493 = vpow2.f32 %v840_v37 }
 0x2c7   : > { %1495 = vpow2.f32 %v661_v44 }
 0x2c8   : > { %1497 = vpow2.f32 %v745_v47 }
 0x2c9   : > { %v859_v38 = vpop.permute.xlu1 %858  ;;  %1499 = vpow2.f32 %v832_v49 }
 0x2ca   : > { %v864_v39 = vsel %vm690_vm5, %v859_v38, 0  ;;  %1501 = vpow2.f32 %v916_v43 }
 0x2cb   : > { %873 = vmatpush.bf16.msra.mxu0 %v864_v39 }
 0x2cc   : > { %v1494_v40 = vpop.eup %1493 }
 0x2cd   : > { %v857_v41 = vpack.c.bf16 %v1494_v40, %v1494_v40  ;;  %v844_v42 = vsel %vm635_vm2, %v1494_v40, 0.0  ;;  %v1496_v50 = vpop.eup %1495 }
 0x2ce   : > { %845 = vadd.xlane.f32.xlu2 %v844_v42  ;;  %v672_v52 = vmul.f32 %v1496_v50, %v671_v51  ;;  %v1498_v56 = vpop.eup %1497  ;;  %v1347_v51 = vld [vmem:[#allocation15] sm:$0xff] }
 0x2cf   : > { %1325 = vmatmul.msk.bf16.vlgmr.msra.gmra.mxu0 %vm635_vm2, %v857_v41  ;;  %v1500_v45 = vpop.eup %1499 }
 0x2d0   : > { %v1502_v58 = vpop.eup %1501 }
 0x2d5   : > { %1327 = vmatmul.msk.bf16.vlgmr.msra.gmra.mxu2 %vm635_vm2, %v941_v46 }
 0x2dd   : > { %682 = vperm.xlu1 %1475, %v1496_v50   ;;  %v1348_v50 = vld [vmem:[#allocation15 + $0x8] sm:$0xff] }
 0x2de   : > { %1101 = vmatpush.bf16.msra.mxu3 %v1348_v50 }
 0x2e2   : > { %v675_v53 = vpop.xlane.xlu0 %674  ;;  %1102 = vmatpush.bf16.msra.mxu3 %v1347_v51 }
 0x2e3   : > { %v676_v55 = vadd.f32 %v675_v53, %v672_v52 }
 0x2e5   : > { %678 = vst.msk [vmem:[#allocation4] sm:$0xff] %vm677_vm4, %v676_v55  ;;  %v703_v48 = vpop.f32.mrf.mxu0  ;;  %1477 = vset.pattern.permute.xlu1 %v1798_v60 }
 0x2e6   : > { %853 = vperm.xlu1 %1477, %v1500_v45   ;;  %766 = vperm.xlu2 %1476, %v1498_v56  }
 0x2ec   : > { %v755_v59 = vld [vmem:[#allocation4] sm:$0xff] }
 0x2ed   : > { %v705_v57 = vpop.f32.mrf.mxu0  ;;  %v756_v61 = vmul.f32 %v1498_v56, %v755_v59 }
 0x2ee   : > { %1478 = vset.pattern.permute.xlu2 %v1799_v63 }
 0x2ef   : > { %937 = vperm.xlu2 %1478, %v1502_v58  }
 0x2f7   : > { %1480 = vset.pattern.permute.xlu2 %v1797_v54 }
 0x333   : > { %v930_v54 = vpop.xlane.xlu0 %929 }
 0x337   : > { %v759_v62 = vpop.xlane.xlu1 %758 }
 0x338   : > { %v760_v0 = vadd.f32 %v759_v62, %v756_v61  ;;  %v1486_v62 = vld [vmem:[%s2188_s9] ss:$0 sm:$0xff] }
 0x33a   : > { %762 = vst.msk [vmem:[#allocation4] sm:$0xff] %vm761_vm6, %v760_v0 }
 0x341   : > { %v842_v1 = vld [vmem:[#allocation4] sm:$0xff]  ;;  %v846_v3 = vpop.xlane.xlu2 %845 }
 0x342   : > { %v843_v2 = vmul.f32 %v1500_v45, %v842_v1 }
 0x344   : > { %v847_v60 = vadd.f32 %v846_v3, %v843_v2 }
 0x346   : > { %849 = vst.msk [vmem:[#allocation4] sm:$0xff] %vm848_vm7, %v847_v60 }
 0x348   : > { %v791_v5 = vpop.f32.mrf.mxu2 }
 0x349   : > { %796 = vrot.lane.b32.xlu0 %v791_v5, %s1800_s21  ;;  %v767_v31 = vpop.permute.xlu2 %766 }
 0x34c   : > { %v875_v6 = vpop.f32.mrf.mxu0 }
 0x34d   : > { %v926_v7 = vld [vmem:[#allocation4] sm:$0xff] }
 0x34e   : > { %v927_v9 = vmul.f32 %v1502_v58, %v926_v7 }
 0x34f   : > { %v683_v10 = vpop.permute.xlu1 %682 }
 0x350   : > { %v931_v11 = vadd.f32 %v930_v54, %v927_v9  ;;  %v685_v12 = vmul.f32 %v683_v10, %v679_v8  ;;  %v793_v13 = vpop.f32.mrf.mxu2 }
 0x351   : > { %880 = vrot.lane.b32.xlu0 %v875_v6, %s1801_s3  ;;  %v938_v40 = vpop.permute.xlu2 %937 }
 0x352   : > { %933 = vst.msk [vmem:[#allocation4] sm:$0xff] %vm932_vm8, %v931_v11  ;;  %v707_v14 = vadd.f32 %v703_v48, %v685_v12 }
 0x354   : > { %708 = vst.msk [vmem:[#allocation5] sm:$0xff] %vm635_vm2, %v707_v14  ;;  %v877_v15 = vpop.f32.mrf.mxu0 }
 0x358   : > { %v959_v16 = vpop.f32.mrf.mxu2  ;;  %v854_v35 = vpop.permute.xlu1 %853 }
 0x359   : > { %964 = vrot.lane.b32.xlu1 %v959_v16, %s1802_s29  ;;  %v1022_v17 = vld [vmem:[#allocation4] sm:$0xff] }
 0x35a   : > { %v1023_v18 = vmul.f32 5.656854, %v1022_v17 }
 0x35b   : > { %v763_v30 = vld [vmem:[#allocation5] sm:$0xff] }
 0x35c   : > { %1503 = vrcp.f32 %v1023_v18  ;;  %v1035_v23 = vand.u32 2147483648, %v1023_v18  ;;  %v1033_v25 = vand.u32 2147483647, %v1023_v18  ;;  %vm1029_vm10 = vweird.f32 %v1023_v18 }
 0x35d   : > { %v769_v32 = vmul.f32 %v767_v31, %v763_v30 }
 0x35e   : > { %v1036_v27 = vor.u32 1.1754944e-38, %v1035_v23  ;;  %vm1034_vm12 = vcmp.eq.f32.partialorder %v1033_v25, 8.507059e+37 }
 0x360   : > { %v961_v19 = vpop.f32.mrf.mxu2 }
 0x362   : > { %v1504_v20 = vpop.eup %1503 }
 0x363   : > { %v1025_v21 = vmul.f32 %v1504_v20, %v1023_v18  ;;  %vm1030_vm9 = vweird.f32 %v1504_v20 }
 0x364   : > { %vm1031_vm11 = vmor %vm1029_vm10, %vm1030_vm9 }
 0x365   : > { %v1026_v22 = vsub.f32 1.0, %v1025_v21 }
 0x367   : > { %v1027_v24 = vmul.f32 %v1504_v20, %v1026_v22 }
 0x369   : > { %v1028_v26 = vadd.f32 %v1504_v20, %v1027_v24 }
 0x36b   : > { %v1032_v28 = vsel %vm1031_vm11, %v1504_v20, %v1028_v26 }
 0x36c   : > { %v1037_v29 = vsel %vm1034_vm12, %v1036_v27, %v1032_v28 }
 0x36d   : > { %1041 = vperm.xlu1 %1477, %v1037_v29   ;;  %1017 = vperm.xlu2 %1480, %v1037_v29  }
 0x36e   : > { %993 = vperm.xlu0 %1479, %v1037_v29  }
 0x375   : > { %1481 = vset.pattern.permute.xlu2 %v1799_v63 }
 0x376   : > { %1065 = vperm.xlu2 %1481, %v1037_v29   ;;  %1482 = vset.pattern.permute.xlu0 %v1799_v63 }
 0x3bb   : > { %v797_v33 = vpop.permute.xlu0 %796 }
 0x3bc   : > { %v799_v34 = vadd.f32 %v797_v33, %v769_v32 }
 0x3be   : > { %801 = vst.msk [vmem:[#allocation5] sm:$0xff] %vm800_vm13, %v799_v34 }
 0x3c3   : > { %v881_v38 = vpop.permute.xlu0 %880 }
 0x3c5   : > { %v850_v36 = vld [vmem:[#allocation5] sm:$0xff] }
 0x3c6   : > { %v856_v37 = vmul.f32 %v854_v35, %v850_v36 }
 0x3c7   : > { %v1018_v52 = vpop.permute.xlu2 %1017 }
 0x3c8   : > { %v883_v39 = vadd.f32 %v881_v38, %v856_v37 }
 0x3ca   : > { %885 = vst.msk [vmem:[#allocation5] sm:$0xff] %vm884_vm14, %v883_v39 }
 0x3cb   : > { %v965_v63 = vpop.permute.xlu1 %964 }
 0x3d0   : > { %v1066_v48 = vpop.permute.xlu2 %1065 }
 0x3d1   : > { %v934_v41 = vld [vmem:[#allocation5] sm:$0xff] }
 0x3d2   : > { %v940_v42 = vmul.f32 %v938_v40, %v934_v41 }
 0x3d4   : > { %v967_v44 = vadd.f32 %v965_v63, %v940_v42 }
 0x3d6   : > { %969 = vst.msk [vmem:[#allocation5] sm:$0xff] %vm968_vm15, %v967_v44 }
 0x3dd   : > { %v990_v47 = vld [vmem:[#allocation5] sm:$0xff] }
 0x3df   : > { %v1042_v56 = vpop.permute.xlu1 %1041 }
 0x3e0   : > { %v994_v46 = vpop.permute.xlu0 %993 }
 0x3e1   : > { %v996_v49 = vmul.f32 %v994_v46, %v990_v47 }
 0x3e3   : > { %997 = vst.msk [vmem:[#allocation5] sm:$0xff] %vm635_vm2, %v996_v49 }
 0x3ea   : > { %v1014_v53 = vld [vmem:[#allocation5] sm:$0xff] }
 0x3eb   : > { %v1020_v55 = vmul.f32 %v1018_v52, %v1014_v53 }
 0x3ed   : > { %1021 = vst.msk [vmem:[#allocation5] sm:$0xff] %vm800_vm13, %v1020_v55 }
 0x3f4   : > { %v1038_v43 = vld [vmem:[#allocation5] sm:$0xff] }
 0x3f5   : > { %v1044_v45 = vmul.f32 %v1042_v56, %v1038_v43 }
 0x3f7   : > { %1045 = vst.msk [vmem:[#allocation5] sm:$0xff] %vm884_vm14, %v1044_v45 }
 0x3fe   : > { %v1062_v57 = vld [vmem:[#allocation5] sm:$0xff] }
 0x3ff   : > { %v1068_v58 = vmul.f32 %v1066_v48, %v1062_v57 }
 0x401   : > { %1069 = vst.msk [vmem:[#allocation5] sm:$0xff] %vm968_vm15, %v1068_v58 }
 0x408   : > { %v1070_v59 = vld [vmem:[#allocation5] sm:$0xff] }
 0x409   : > { %v1071_v61 = vpack.c.bf16 %v1070_v59, %v1070_v59 }
 0x40b   : > { %1336 = vmatmul.msk.bf16.vlgmr.msra.gmra.mxu3 %vm536_vm0, %v1071_v61 }
 0x48e   : > { %v1104_v0 = vpop.f32.mrf.mxu3 }
 0x48f   : > { %v1105_v1 = vadd.f32 %v1486_v62, %v1104_v0 }
 0x491   : > { %v1109_v2 = vadd.f32 %v1105_v1, %v2005_v4 }
 0x493   : > { %1110 = vst.msk [vmem:[%s508_s19] sm:$0xff] %vm536_vm0, %v1109_v2 }
 0x494   : > { %1712 = shalt.err (!%p1709_p13)
}
 0x495   : > { %1369 = dma.vmem_to_hbm [thread:$0]  (%p1950_p2), %s1126_s20, 128, %s1128_s26, %s1112_s16  }
 0x496   : > { %v1106_v4 = vpop.f32.mrf.mxu3 }
 0x497 PF: > { %s2219_s8 = sld [smem:[#allocation24_spill]]  ;;  %p1392_p0 = pnand %p1280_p6, %p1957_p5 }
 0x499   : > { %p1393_p4 = pneg %p1392_p0 }
 0x49d   : > { %s1139_s3 = sand.u32 1, %s2219_s8  }
 0x49e   : > { %s1140_s29 = scalar_lea.sflag [#allocation8], %s1139_s3 }
 0x49f   : > { %1758 = dma.done.wait (%p1393_p4), %s1140_s29, 128  }
 0x4a0   : > { %1760 = vsyncadd (%p1393_p4), %s1140_s29, 4294967168  ;;  %s31_s18 = sadd.s32 1, %s1783_s18   ;;  %s2221_s24 = sld [smem:[#allocation25_spill]] }
 0x4a1   : > { %p28_p7 = scmp.ge.s32.totalorder %s31_s18, 4   ;;  %s2222_s15 = sld [smem:[#allocation29_spill]] }
 0x4a2   : > { %s2223_s16 = sld [smem:[#allocation26_spill]]  ;;  %s2225_s13 = smov %s1767_s14 }
 0x4a3   : > { %s2224_s17 = sld [smem:[#allocation27_spill]]  ;;  %30 = sbr.rel (!%p28_p7) target bundleno = 15 (0xf), region = 142 }
 0x4a6   : > { %s2226_s14 = smov %s2221_s24 }
 0x4a8   :  { %1146 = vsyncpa [#allocation7], 1 }
 0x4a9   :  { %1148 = vsyncpa [#allocation7 + $0x1], 1 }
 0x4aa   :  { %1149 = vsyncpa [#allocation10], 1 }
 0x4ab   :  { %1151 = vsyncpa [#allocation10 + $0x1], 1 }
 0x4ac   :  { %1152 = vsyncpa [#allocation13], 1 }
 0x4ad   :  { %1153 = vsyncpa [#allocation16], 1 }
 0x4ae   :  { %1154 = vsyncpa [#allocation8], 1 }
 0x4af   :  { %1156 = vsyncpa [#allocation8 + $0x1], 1 }

</bundles_post_ra>
